<compile_context>
chip_gen: v7x
topology: tpu7x:2x2x1
jax: 0.10.0
libtpu: 0.0.40
codegen_flags: <defaults>
</compile_context>

<pallas_src>
import math

import jax
import jax.numpy as jnp
from jax.experimental import pallas as pl
from jax.experimental.pallas import tpu as pltpu


def _round_up(x, m):
    return ((x + m - 1) // m) * m


def _cdiv(a, b):
    return -(-a // b)


def _chip_info():
    """(physical VMEM bytes, has-2-TensorCores?) with conservative fallbacks."""
    phys = 64 * 1024 * 1024            # smallest per-core VMEM in the fleet (v7x)
    try:
        phys = int(pltpu.get_tpu_info().vmem_capacity_bytes)
    except Exception:
        pass
    two_tc = False
    try:
        kind = jax.devices()[0].device_kind.lower()
        two_tc = ("v7" in kind) or ("7x" in kind)   # v5e / v6e have a single TensorCore
    except Exception:
        pass
    return phys, two_tc


def _chunk_plan(L, D):
    """(mode, chunk_width, n_chunks) for the in-kernel masked accumulate.

    'chunks'  : lane-chunked prefix-mask accumulate over C-lane slices; C is a multiple
                of 128 and of D with C/D a power of two, so the final fold to D is a
                log2 tree of slab adds + lane rolls.
    'per_char': per-character accumulate (any L/D); used when L*D is not a multiple of
                lcm(D, 128).
    """
    width = L * D
    base = D * (128 // math.gcd(D, 128))            # lcm(D, 128); base/D is a power of two
    if width % base == 0:
        C = base
        while C * 2 <= 512 and width % (C * 2) == 0:
            C *= 2                                   # grow chunks up to 512 lanes
        return "chunks", C, width // C
    return "per_char", D, L


def _pick_tile(N, width, D, itemsize, chunk_w, phys, two_tc):
    """Rows per grid step, sized from this chip's VMEM and HBM generation."""
    pack = max(8, 32 // itemsize)                    # sublane pack: 8 f32, 16 bf16, 32 int8
    # Per-row VMEM: double-buffered input + double-buffered output + chunk-sized f32
    # intermediates (acc, masked chunk, rem iota).  Chunking keeps these ~chunk_w wide.
    per_row = 2 * width * itemsize + 2 * D * 4 + 12 * chunk_w + 64
    budget = phys // 2                               # headroom for Mosaic internal scratch
    cap = max(pack, (budget // per_row) // pack * pack)

    # Per-step input-block target: big enough that the ~0.35 us fixed grid-step cost is
    # a small fraction of HBM time.  v7x (3.2 TB/s) needs ~2.5x bigger steps than v5e/v6e.
    target_bytes = (20 << 20) if two_tc else (8 << 20)
    target = max(pack, (target_bytes // max(1, width * itemsize)) // pack * pack)

    tile_n = min(cap, target)
    if two_tc and N > pack:
        # 2 TensorCores: keep an even, balanced step count so neither core idles.
        steps = _round_up(max(2, _cdiv(N, tile_n)), 2)
        tile_n = _round_up(_cdiv(N, steps), pack)
    if tile_n >= N:
        tile_n = N                                   # one block == full dim (always legal)
    return tile_n


def _vmem_limit(tile_n, width, D, itemsize, chunk_w, phys):
    per_row = 2 * width * itemsize + 2 * D * 4 + 12 * chunk_w + 64
    needed = tile_n * per_row + (8 << 20)
    return int(min(phys * 9 // 10, max(needed, 32 << 20)))


def _make_kernel(L, D, mode, chunk_w, n_chunks):
    def kernel(len_ref, x_ref, o_ref):
        # len_ref: (tn, 1) int32    x_ref: (tn, L*D)    o_ref: (tn, D)
        tn = x_ref.shape[0]
        lengths = len_ref[...]                                        # (tn, 1) int32

        if mode == "chunks":
            # Valid chars are a contiguous prefix of the flattened row: global lane j
            # belongs to char j // D, so "char < length" == "lane < length * D".
            # Hoist the lane iota and the single (tn,1)->(tn,C) broadcast; per-chunk
            # masking is then just a vector-vs-scalar compare (no re-broadcast).
            lane = jax.lax.broadcasted_iota(jnp.int32, (tn, chunk_w), 1)
            rem = jnp.minimum(lengths, L) * D - lane                  # (tn, C) int32

            def masked_chunk(c):
                # Static, 128-aligned lane slice of the VMEM block: aligned loads, and
                # the chunk temporary dies right after the accumulate (chunk-sized
                # live set instead of 4x full-row temporaries).
                xc = x_ref[:, c * chunk_w:(c + 1) * chunk_w]
                return jnp.where(rem > c * chunk_w, xc, 0).astype(jnp.float32)

            acc = masked_chunk(0)
            for c in range(1, n_chunks):
                acc = acc + masked_chunk(c)

            # Fold the C-lane accumulator down to D lanes (C/D is a power of two).
            # Stage 1: tile-aligned slab adds (pure VPU); the `>= D` guard prevents
            # folding inside the embedding dim when D > 128.
            w = acc.shape[1]
            while w > 128 and (w // 2) % 128 == 0 and (w // 2) >= D:
                half = w // 2
                acc = acc[:, :half] + acc[:, half:]
                w = half
            # Stage 2: XLU lane rolls + VPU adds within the remaining span.
            aw = acc.shape[1]
            while w > D:
                half = w // 2
                acc = acc + pltpu.roll(acc, shift=(aw - half) % aw, axis=1)
                w = half
            summed = acc if acc.shape[1] == D else acc[:, :D]         # (tn, D) f32
        else:
            # Fallback for L*D not a multiple of lcm(D,128): per-character masked
            # accumulate with a single hoisted length broadcast (no full-block temps).
            len_b = jnp.broadcast_to(lengths, (tn, D))

            def char_chunk(t):
                xc = x_ref[:, t * D:(t + 1) * D]
                return jnp.where(len_b > t, xc, 0).astype(jnp.float32)

            acc = char_chunk(0)
            for t in range(1, L):
                acc = acc + char_chunk(t)
            summed = acc

        # mean = sum * (1 / clamp(len, 1)); per-row reciprocal (tn divides, not tn*D).
        inv = pl.reciprocal(jnp.maximum(lengths, 1).astype(jnp.float32), approx=False)
        o_ref[...] = (summed * inv).astype(o_ref.dtype)

    return kernel


def avgpool_char2token(char_embeddings, token_lengths, *, tile_n=None, vmem_limit_bytes=None):
    """char_embeddings: [N, L, D] float; token_lengths: any shape flattening to [N] int."""
    token_lengths = jnp.ravel(token_lengths).astype(jnp.int32)
    N, L, D = char_embeddings.shape
    assert token_lengths.shape[0] == N

    width = L * D
    itemsize = jnp.dtype(char_embeddings.dtype).itemsize
    mode, chunk_w, n_chunks = _chunk_plan(L, D)
    phys, two_tc = _chip_info()

    if tile_n is None:
        tile_n = _pick_tile(N, width, D, itemsize, chunk_w, phys, two_tc)
    else:
        pack = max(8, 32 // itemsize)
        tile_n = int(tile_n)
        tile_n = N if tile_n >= N else max(pack, tile_n // pack * pack)
    if vmem_limit_bytes is None:
        vmem_limit_bytes = _vmem_limit(tile_n, width, D, itemsize, chunk_w, phys)

    # Lane-dense layout: contiguous reshape (N, L, D) -> (N, L*D) is free.
    x2 = char_embeddings.reshape(N, width)

    # Ragged grid: no padding copy of the [N, L*D] input (that would double HBM traffic
    # on a bandwidth-bound op).  Only the tiny [N] lengths vector is padded so tail rows
    # of the last block see length 0; their out-of-bounds output rows are dropped.
    steps = _cdiv(N, tile_n)
    n_len = steps * tile_n
    lengths_1d = token_lengths if n_len == N else jnp.pad(token_lengths, (0, n_len - N))
    lengths_2d = lengths_1d.reshape(n_len, 1)

    cp_kwargs = dict(dimension_semantics=("parallel",))
    if vmem_limit_bytes is not None:
        cp_kwargs["vmem_limit_bytes"] = int(vmem_limit_bytes)

    out = pl.pallas_call(
        _make_kernel(L, D, mode, chunk_w, n_chunks),
        out_shape=jax.ShapeDtypeStruct((N, D), char_embeddings.dtype),
        grid_spec=pltpu.PrefetchScalarGridSpec(
            num_scalar_prefetch=0,
            grid=(steps,),
            in_specs=[
                pl.BlockSpec((tile_n, 1), lambda i: (i, 0)),        # token_lengths
                pl.BlockSpec((tile_n, width), lambda i: (i, 0)),    # char embeddings (lane-dense)
            ],
            out_specs=pl.BlockSpec((tile_n, D), lambda i: (i, 0)),
        ),
        compiler_params=pltpu.CompilerParams(**cp_kwargs),
    )(lengths_2d, x2)

    return out


def _reference(char_embeddings, token_lengths):
    # Pure-JAX reference mirroring the PyTorch forward.
    token_lengths = jnp.ravel(token_lengths).astype(jnp.int32)
    N, L, D = char_embeddings.shape
    mask = jnp.arange(L)[None, :] >= token_lengths[:, None]          # (N, L)
    x = jnp.where(mask[:, :, None], 0.0, char_embeddings)
    summed = x.sum(axis=1)
    denom = jnp.maximum(token_lengths, 1).astype(char_embeddings.dtype)[:, None]
    return summed / denom


if __name__ == "__main__":
    key = jax.random.PRNGKey(0)
    k_emb, k_len = jax.random.split(key)

    # Small shapes consistent with the forward: N = 16 tokens, L = 8 chars/token, D = 32.
    N, L, D = 16, 8, 32
    char_embeddings = jax.random.normal(k_emb, (N, L, D), dtype=jnp.float32)
    token_lengths = jax.random.randint(k_len, (N,), 0, L + 1, dtype=jnp.int32)
    token_lengths = token_lengths.at[0].set(L).at[1].set(0)          # exercise clamp(min=1)

    out = jax.block_until_ready(avgpool_char2token(char_embeddings, token_lengths))
    ref = _reference(char_embeddings, token_lengths)
    assert out.shape == (N, D)
    assert jnp.allclose(out, ref, atol=1e-5, rtol=1e-5), "mismatch vs reference"

    # Ragged N with a single full block (tile_n == N, no padding of the input).
    N2 = 13
    out2 = jax.block_until_ready(
        avgpool_char2token(char_embeddings[:N2], token_lengths[:N2]))
    ref2 = _reference(char_embeddings[:N2], token_lengths[:N2])
    assert out2.shape == (N2, D)
    assert jnp.allclose(out2, ref2, atol=1e-5, rtol=1e-5), "mismatch (ragged N, 1 block)"

    # Ragged N with multiple grid steps (last block partially out of bounds).
    out3 = jax.block_until_ready(
        avgpool_char2token(char_embeddings[:N2], token_lengths[:N2], tile_n=8))
    assert out3.shape == (N2, D)
    assert jnp.allclose(out3, ref2, atol=1e-5, rtol=1e-5), "mismatch (ragged last block)"

    # Row width not a multiple of lcm(D,128) -> per-character accumulate path.
    L4 = 6
    emb4 = jax.random.normal(k_emb, (N, L4, D), dtype=jnp.float32)
    len4 = jnp.clip(token_lengths, 0, L4)
    out4 = jax.block_until_ready(avgpool_char2token(emb4, len4))
    ref4 = _reference(emb4, len4)
    assert jnp.allclose(out4, ref4, atol=1e-5, rtol=1e-5), "mismatch (per-char path)"

    print("KERNEL_OK")
</pallas_src>

<mosaic_0001>
module attributes {stable_mosaic.version = 11 : i64} {
  func.func @kernel(%arg0: i32, %arg1: memref<16x1xi32, #tpu.memory_space<vmem>>, %arg2: memref<16x256xf32, #tpu.memory_space<vmem>>, %arg3: memref<16x32xf32, #tpu.memory_space<vmem>>) attributes {dimension_semantics = [#tpu.dimension_semantics<parallel>], iteration_bounds = array<i64: 1>, scalar_prefetch = 0 : i64, scratch_operands = 0 : i64, tpu.core_type = #tpu.core_type<tc>, window_params = [{transform_indices = @transform_0, window_bounds = array<i64: 16, 1>}, {transform_indices = @transform_1, window_bounds = array<i64: 16, 256>}, {transform_indices = @transform_2, window_bounds = array<i64: 16, 32>}]} {
    %c0 = arith.constant 0 : index
    %c0_0 = arith.constant 0 : index
    %0 = vector.load %arg1[%c0, %c0_0] : memref<16x1xi32, #tpu.memory_space<vmem>>, vector<16x1xi32>
    %1 = tpu.iota {dimensions = array<i32: 1>} : vector<16x256xi32>
    %c8_i32 = arith.constant 8 : i32
    %2 = vector.broadcast %c8_i32 : i32 to vector<16x1xi32>
    %3 = arith.minsi %0, %2 : vector<16x1xi32>
    %c32_i32 = arith.constant 32 : i32
    %4 = vector.broadcast %c32_i32 : i32 to vector<16x1xi32>
    %5 = arith.muli %3, %4 : vector<16x1xi32>
    %6 = vector.broadcast %5 : vector<16x1xi32> to vector<16x256xi32>
    %7 = arith.subi %6, %1 : vector<16x256xi32>
    %c0_1 = arith.constant 0 : index
    %c0_2 = arith.constant 0 : index
    %8 = vector.load %arg2[%c0_1, %c0_2] : memref<16x256xf32, #tpu.memory_space<vmem>>, vector<16x256xf32>
    %c0_i32 = arith.constant 0 : i32
    %9 = vector.broadcast %c0_i32 : i32 to vector<16x256xi32>
    %10 = arith.cmpi sgt, %7, %9 : vector<16x256xi32>
    %c0_i32_3 = arith.constant 0 : i32
    %11 = arith.sitofp %c0_i32_3 : i32 to f32
    %12 = vector.broadcast %11 : f32 to vector<16x256xf32>
    %13 = arith.select %10, %8, %12 : vector<16x256xi1>, vector<16x256xf32>
    %14 = vector.extract_strided_slice %13 {offsets = [0, 0], sizes = [16, 128], strides = [1, 1]} : vector<16x256xf32> to vector<16x128xf32>
    %15 = vector.extract_strided_slice %13 {offsets = [0, 128], sizes = [16, 128], strides = [1, 1]} : vector<16x256xf32> to vector<16x128xf32>
    %16 = arith.addf %14, %15 : vector<16x128xf32>
    %c64_i32 = arith.constant 64 : i32
    %17 = tpu.dynamic_rotate %16 by %c64_i32 dim 1 : vector<16x128xf32>, i32 -> vector<16x128xf32>
    %18 = arith.addf %16, %17 : vector<16x128xf32>
    %c96_i32 = arith.constant 96 : i32
    %19 = tpu.dynamic_rotate %18 by %c96_i32 dim 1 : vector<16x128xf32>, i32 -> vector<16x128xf32>
    %20 = arith.addf %18, %19 : vector<16x128xf32>
    %21 = vector.extract_strided_slice %20 {offsets = [0, 0], sizes = [16, 32], strides = [1, 1]} : vector<16x128xf32> to vector<16x32xf32>
    %c1_i32 = arith.constant 1 : i32
    %22 = vector.broadcast %c1_i32 : i32 to vector<16x1xi32>
    %23 = arith.maxsi %0, %22 : vector<16x1xi32>
    %24 = arith.sitofp %23 : vector<16x1xi32> to vector<16x1xf32>
    %25 = tpu.reciprocal %24 : vector<16x1xf32> -> vector<16x1xf32>
    %26 = vector.broadcast %25 : vector<16x1xf32> to vector<16x32xf32>
    %27 = arith.mulf %21, %26 : vector<16x32xf32>
    %c0_4 = arith.constant 0 : index
    %c0_5 = arith.constant 0 : index
    %28 = vector.load %arg3[%c0_4, %c0_5] : memref<16x32xf32, #tpu.memory_space<vmem>>, vector<16x32xf32>
    tpu.vector_store %arg3[%c0_4, %c0_5], %27 {strides = array<i32>} : memref<16x32xf32, #tpu.memory_space<vmem>>, vector<16x32xf32>,
    return
  }
  func.func @transform_0(%arg0: i32) -> (i32, i32) {
    %c0_i32 = arith.constant 0 : i32
    %c0_i32_0 = arith.constant 0 : i32
    return %arg0, %c0_i32 : i32, i32
  }
  func.func @transform_1(%arg0: i32) -> (i32, i32) {
    %c0_i32 = arith.constant 0 : i32
    %c0_i32_0 = arith.constant 0 : i32
    return %arg0, %c0_i32 : i32, i32
  }
  func.func @transform_2(%arg0: i32) -> (i32, i32) {
    %c0_i32 = arith.constant 0 : i32
    %c0_i32_0 = arith.constant 0 : i32
    return %arg0, %c0_i32 : i32, i32
  }
}

</mosaic_0001>

<bundles_post_ra>
// kernel: tpu_custom_call.1
= control target key start
LH: loop header
LB: loop body
LE: loop exit
PB: predicated region body
PF: predicated region fallthrough
CT: control target
= control target key end

     0   :  { %7 = vsyncpa [#allocation3], 0  ;;  %s230_s0 = inlined_call_operand.vmem [shape: s32[16,1], index: 0, kind: input, shape index: {}]   ;;  %s231_s1 = inlined_call_operand.hbm [shape: f32[16,256], index: 1, kind: input, shape index: {}]   ;;  %s232_s2 = inlined_call_operand.hbm [shape: f32[16,32], index: 2, kind: output, shape index: {}]  }
   0x1   :  { %8 = vsyncpa [#allocation4], 0  ;;  %s176_s9 = smov [#allocation2]   ;;  %s128_s13 = scalar_lea.hbm %s231_s1, 512 }
   0x2   :  { %s16_s10 = sshll.u32 %s176_s9, 4  ;;  %p129_p0 = scmp.ne.s32.totalorder %s231_s1, %s128_s13  ;;  %s17_s10 = int_to_ptr.vmem [resolvable:$true] %s16_s10 }
   0x3   :  { %p132_p1 = scmp.lt.u32.totalorder %s128_s13, %s231_s1 }
   0x5   :  { %p134_p2 = pnand %p132_p1, %p129_p0 }
   0x7   :  { %137 = shalt.err (!%p134_p2)
}
   0x8   :  { %s138_s18 = scalar_lea.vmem %s17_s10, 512  ;;  %p143_p4 = scmp.lt.s32.totalorder %s17_s10, %s17_s10 }
   0x9   :  { %p139_p3 = scmp.ne.s32.totalorder %s17_s10, %s138_s18  ;;  %p144_p5 = scmp.lt.s32.totalorder %s138_s18, %s138_s18 }
   0xb   :  { %p145_p6 = por %p144_p5, %p143_p4 }
   0xd   :  { %p146_p7 = pnand %p145_p6, %p139_p3 }
   0xf   :  { %149 = shalt.err (!%p146_p7)
}
  0x10   :  { %s177_s19 = smov 256   ;;  %s178_s20 = smov 16  }
  0x11   :  { %22 = dma.hbm_to_vmem [thread:$0]  %s231_s1, 512, %s17_s10, [#allocation3], %s177_s19, %s177_s19, %s178_s20  }
  0x12   :  { %172 = dma.done.wait [#allocation3], 512  }
  0x13   :  { %173 = vsyncadd [#allocation3], 4294966784  ;;  %v179_v0 = vmov 0   ;;  %v26_v1 = vld [vmem:[%s230_s0] sm:$0xff]  ;;  %v27_v2 = vld [vmem:[%s230_s0 + $0x8] sm:$0xff]  ;;  %v28_v10 = vlaneseq  ;;  %s180_s0 = smov 64  }
  0x14   :  { %122 = vset.pattern.permute.xlu0 %v179_v0  ;;  %123 = vset.pattern.permute.xlu1 %v179_v0  ;;  %vm31_vm0 = vcmp.lt.s32.totalorder %v26_v1, 8  ;;  %vm73_vm1 = vcmp.gt.s32.totalorder %v26_v1, 1  ;;  %vm33_vm2 = vcmp.lt.s32.totalorder %v27_v2, 8  ;;  %vm75_vm3 = vcmp.gt.s32.totalorder %v27_v2, 1  ;;  %v47_v18 = vld [vmem:[#allocation2] sm:$0xff]  ;;  %v48_v19 = vld [vmem:[#allocation2 + $0x8] sm:$0xff] }
  0x15   :  { %v32_v3 = vsel %vm31_vm0, %v26_v1, 8  ;;  %v74_v4 = vsel %vm73_vm1, %v26_v1, 1  ;;  %v34_v5 = vsel %vm33_vm2, %v27_v2, 8  ;;  %v29_v11 = vand.u32 127, %v28_v10  ;;  %v49_v23 = vld [vmem:[#allocation2 + $0x10] sm:$0xff]  ;;  %v50_v24 = vld [vmem:[#allocation2 + $0x18] sm:$0xff] }
  0x16   :  { %v35_v6 = vmul.u32 32, %v32_v3  ;;  %v77_v7 = vcvt.s32.f32 %v74_v4  ;;  %v36_v8 = vmul.u32 32, %v34_v5  ;;  %v76_v12 = vsel %vm75_vm3, %v27_v2, 1  ;;  %s181_s1 = smov 96   ;;  %s182_s27 = smov [#allocation5]  }
  0x17   :  { %v30_v13 = vadd.s32 128, %v29_v11  ;;  %v78_v14 = vcvt.s32.f32 %v76_v12  ;;  %vm93_vm8 = vcmask 261120   ;;  %s101_s28 = sshll.u32 %s182_s27, 4  ;;  %s102_s28 = int_to_ptr.vmem [resolvable:$true] %s101_s28 }
  0x18   :  { %124 = vrcp.f32 %v77_v7  ;;  %38 = vperm.xlu0 %122, %v35_v6   ;;  %s150_s29 = scalar_lea.vmem %s102_s28, 256  ;;  %p155_p9 = scmp.lt.s32.totalorder %s102_s28, %s102_s28 }
  0x19   :  { %126 = vrcp.f32 %v78_v14  ;;  %p151_p8 = scmp.ne.s32.totalorder %s102_s28, %s150_s29  ;;  %p156_p10 = scmp.lt.s32.totalorder %s150_s29, %s150_s29 }
  0x1b   :  { %p157_p11 = por %p156_p10, %p155_p9 }
  0x1c   :  { %41 = vperm.xlu0 %122, %v36_v8  }
  0x1d   :  { %p158_p12 = pnand %p157_p11, %p151_p8 }
  0x22   :  { %v125_v9 = vpop.eup %124 }
  0x23   :  { %83 = vperm.xlu0 %122, %v125_v9   ;;  %v127_v31 = vpop.eup %126 }
  0x97   :  { %v39_v15 = vpop.permute.xlu0 %38 }
  0x98   :  { %v43_v16 = vsub.s32 %v39_v15, %v29_v11  ;;  %v44_v17 = vsub.s32 %v39_v15, %v30_v13 }
  0x9a   :  { %vm51_vm4 = vcmp.gt.s32.totalorder %v43_v16, 0  ;;  %vm52_vm5 = vcmp.gt.s32.totalorder %v44_v17, 0 }
  0x9b   :  { %v42_v20 = vpop.permute.xlu0 %41  ;;  %v55_v21 = vsel %vm51_vm4, %v47_v18, 0.0  ;;  %v56_v22 = vsel %vm52_vm5, %v48_v19, 0.0 }
  0x9c   :  { %v45_v25 = vsub.s32 %v42_v20, %v29_v11  ;;  %v46_v26 = vsub.s32 %v42_v20, %v30_v13  ;;  %v59_v27 = vadd.f32 %v56_v22, %v55_v21 }
  0x9e   :  { %vm53_vm6 = vcmp.gt.s32.totalorder %v45_v25, 0  ;;  %vm54_vm7 = vcmp.gt.s32.totalorder %v46_v26, 0  ;;  %61 = vrot.lane.b32.xlu1 %v59_v27, %s180_s0 }
  0x9f   :  { %v57_v28 = vsel %vm53_vm6, %v49_v23, 0.0  ;;  %v58_v29 = vsel %vm54_vm7, %v50_v24, 0.0 }
  0xa0   :  { %v60_v30 = vadd.f32 %v58_v29, %v57_v28 }
  0xa2   :  { %63 = vrot.lane.b32.xlu1 %v60_v30, %s180_s0  ;;  %v84_v36 = vpop.permute.xlu0 %83 }
  0xa6   :  { %88 = vperm.xlu1 %123, %v127_v31  }
 0x110   :  { %v62_v32 = vpop.permute.xlu1 %61 }
 0x111   :  { %v65_v33 = vadd.f32 %v62_v32, %v59_v27 }
 0x113   :  { %67 = vrot.lane.b32.xlu0 %v65_v33, %s181_s1 }
 0x114   :  { %v64_v34 = vpop.permute.xlu1 %63 }
 0x115   :  { %v66_v35 = vadd.f32 %v64_v34, %v60_v30 }
 0x117   :  { %69 = vrot.lane.b32.xlu1 %v66_v35, %s181_s1 }
 0x125   :  { %v89_v37 = vpop.permute.xlu1 %88 }
 0x185   :  { %v68_v38 = vpop.permute.xlu0 %67 }
 0x186   :  { %v71_v39 = vadd.f32 %v68_v38, %v65_v33 }
 0x188   :  { %v91_v40 = vmul.f32 %v84_v36, %v71_v39 }
 0x189   :  { %v70_v41 = vpop.permute.xlu1 %69 }
 0x18a   :  { %94 = vst.msk [vmem:[#allocation5] sm:$0xff] %vm93_vm8, %v91_v40  ;;  %v72_v42 = vadd.f32 %v70_v41, %v66_v35 }
 0x18c   :  { %v92_v43 = vmul.f32 %v89_v37, %v72_v42 }
 0x18e   :  { %95 = vst.msk [vmem:[#allocation5 + $0x8] sm:$0xff] %vm93_vm8, %v92_v43 }
 0x18f   :  { %161 = shalt.err (!%p158_p12)
}
 0x190   :  { %s162_s4 = scalar_lea.hbm %s232_s2, 256 }
 0x191   :  { %p163_p13 = scmp.ne.s32.totalorder %s232_s2, %s162_s4  ;;  %p166_p0 = scmp.lt.u32.totalorder %s162_s4, %s232_s2 }
 0x193   :  { %p168_p1 = pnand %p166_p0, %p163_p13 }
 0x195   :  { %171 = shalt.err (!%p168_p1)
}
 0x196   :  { %s183_s9 = smov 128   ;;  %s184_s10 = smov 8  }
 0x197   :  { %107 = dma.vmem_to_hbm [thread:$0]  %s102_s28, 256, %s232_s2, [#allocation4], %s183_s9, %s183_s9, %s184_s10  }
 0x198   :  { %174 = dma.done.wait [#allocation4], 256  }
 0x199   :  { %175 = vsyncadd [#allocation4], 4294967040 }
 0x19a   :  { %111 = vsyncpa [#allocation3], 1 }
 0x19b   :  { %112 = vsyncpa [#allocation4], 1 }

</bundles_post_ra>
